<compile_context>
chip_gen: v5e
topology: v5e:2x2
jax: 0.10.0
libtpu: 0.0.40
codegen_flags: <defaults>
</compile_context>

<pallas_src>
import functools
import math

import numpy as np
import jax
import jax.numpy as jnp
from jax.experimental import pallas as pl
from jax.experimental.pallas import tpu as pltpu

_CHUNK = 128                 # points per inner step = one vreg lane width
_HALF_PI = math.pi / 2.0


def _pe_kernel(x_ref, o_ref, *, levels: int, anchor_every: int):
    """x_ref: (3, TILE) lane-dense input; o_ref: (TILE, 3 + 6*levels) final layout."""
    out_dim = 3 + 6 * levels
    pad = (-out_dim) % 8                      # pad rows so the transpose source is 8-aligned
    tile = x_ref.shape[1]
    zpad = jnp.zeros((pad, _CHUNK), jnp.float32) if pad else None   # hoisted (no per-iter bcast)

    def sin_cos_block(freq):
        # cos(a) = sin(a + pi/2): one polynomial pass over a (6, CHUNK) block that is
        # already in the [sin; cos] row order the output layout wants.
        both = jnp.concatenate([freq, freq + _HALF_PI], axis=0)
        sc = jnp.sin(both)
        return sc, sc[0:3, :], sc[3:6, :]

    # Static chunk loop: all slices are static, live values stay bounded per 128-point chunk.
    for j in range(tile // _CHUNK):
        lo = j * _CHUNK
        xc = x_ref[:, lo:lo + _CHUNK].astype(jnp.float32)            # (3, 128), f32 compute
        rows = [xc]
        if levels > 0:
            f = xc * jnp.pi                                          # level-0 argument
            sc, s, c = sin_cos_block(f)                              # exact level 0
            rows.append(sc)
            for l in range(1, levels):
                f = f + f                                            # exact argument doubling
                if l % anchor_every == 0:
                    sc, s, c = sin_cos_block(f)                      # re-anchor: stop error growth
                else:
                    s, c = 2.0 * s * c, 1.0 - 2.0 * s * s            # double-angle recurrence
                    sc = jnp.concatenate([s, c], axis=0)
                rows.append(sc)
        if pad:
            rows.append(zpad)
        blk = jnp.concatenate(rows, axis=0)                          # (out_dim+pad, 128): few vregs
        blk_t = jnp.transpose(blk, (1, 0))                           # XLU (idle here): (128, out_dim+pad)
        o_ref[lo:lo + _CHUNK, :] = blk_t[:, :out_dim].astype(o_ref.dtype)


def positional_encode(x: jax.Array, levels: int, *, tile_n: int = 8192,
                      anchor_every: int = 4, out_dtype=None) -> jax.Array:
    """Pallas equivalent of PositionalEncoder(levels).forward(x): (N, 3) -> (N, 3 + 6*levels)."""
    if x.ndim == 1:
        x = x[None, :]
    assert x.ndim == 2 and x.shape[-1] == 3
    n = x.shape[0]
    out_dim = 3 + 6 * levels
    out_dtype = x.dtype if out_dtype is None else np.dtype(out_dtype)

    # Lane-dense compute layout: coords on sublanes, points on lanes.
    # TODO(synk): this (N,3)->(3,N) transpose is still a separate XLA pass (~24 B/point,
    # ~10-20% of kernel HBM traffic).  Folding it in-kernel needs an unaligned (tile,3)
    # relayout, or an (N,3)-blocked input whose lane-padded strided DMA costs more than the
    # explicit transpose, so it is intentionally kept in the wrapper.
    xt = x.T

    # Tile along N (lanes): big tiles amortize the ~0.35 us/grid-step overhead, but clamp so
    # there are >=2 grid steps whenever possible (lets "parallel" shard over v7x's 2 TCs).
    n_units = pl.cdiv(n, _CHUNK)
    tile_units = min(max(tile_n // _CHUNK, 1), max(n_units // 2, 1))
    tile = _CHUNK * tile_units
    grid = (pl.cdiv(n, tile),)

    num_exact = (1 + (levels - 1) // anchor_every) if levels > 0 else 0
    kernel = functools.partial(_pe_kernel, levels=levels, anchor_every=anchor_every)
    return pl.pallas_call(
        kernel,
        out_shape=jax.ShapeDtypeStruct((n, out_dim), out_dtype),
        grid=grid,
        in_specs=[pl.BlockSpec((3, tile), lambda i: (0, i))],
        out_specs=pl.BlockSpec((tile, out_dim), lambda i: (i, 0)),
        compiler_params=pltpu.CompilerParams(
            dimension_semantics=("parallel",)),
        cost_estimate=pl.CostEstimate(
            flops=int(n * (100 * num_exact + 9 * max(levels - num_exact, 0) + 6)),
            transcendentals=int(6 * n * num_exact),
            bytes_accessed=int(n * (3 * x.dtype.itemsize + out_dim * out_dtype.itemsize)),
        ),
    )(xt)


def _reference(x: jax.Array, levels: int) -> jax.Array:
    # Pure-JAX port of the PyTorch forward, for a correctness check.
    if x.ndim == 1:
        x = x[None, :]
    scales = (2.0 ** jnp.arange(levels, dtype=jnp.float32))[None, :, None]
    freq = scales * jnp.pi * x.astype(jnp.float32)[:, None, :]               # (N, L, 3)
    sin_cos = jnp.concatenate([jnp.sin(freq), jnp.cos(freq)], axis=2)        # (N, L, 6)
    return jnp.concatenate(
        [x, sin_cos.reshape(x.shape[0], -1).astype(x.dtype)], axis=-1)


if __name__ == "__main__":
    k1, k2 = jax.random.split(jax.random.PRNGKey(0))

    # Primary check: small N, not a multiple of the tile (exercises the masked last block),
    # and small enough that the tile clamping still yields a 2-step grid.
    levels, n = 4, 200
    x = jax.random.normal(k1, (n, 3), dtype=jnp.float32)
    out = jax.block_until_ready(positional_encode(x, levels))
    ref = _reference(x, levels)
    assert out.shape == (n, 3 + 6 * levels)
    assert jnp.allclose(out, ref, atol=2e-4, rtol=2e-4), "levels=4 mismatch vs reference"

    # Secondary check: more levels exercises the double-angle recurrence + re-anchoring, the
    # multi-chunk inner loop and a partial final grid block.  Tolerance is looser because at
    # high levels the f32 argument 2^l*pi*x itself carries ~1e-3-level rounding differences.
    levels2, n2 = 10, 1500
    x2 = jax.random.normal(k2, (n2, 3), dtype=jnp.float32)
    out2 = jax.block_until_ready(positional_encode(x2, levels2, tile_n=512))
    ref2 = _reference(x2, levels2)
    assert out2.shape == (n2, 3 + 6 * levels2)
    assert jnp.allclose(out2, ref2, atol=5e-3, rtol=5e-3), "levels=10 mismatch vs reference"

    print("KERNEL_OK")
</pallas_src>

<mosaic_0001>
module attributes {stable_mosaic.version = 11 : i64} {
  func.func @_pe_kernel(%arg0: i32, %arg1: memref<3x128xf32, #tpu.memory_space<vmem>>, %arg2: memref<128x27xf32, #tpu.memory_space<vmem>>) attributes {dimension_semantics = [#tpu.dimension_semantics<parallel>], iteration_bounds = array<i64: 2>, scalar_prefetch = 0 : i64, scratch_operands = 0 : i64, tpu.core_type = #tpu.core_type<tc>, window_params = [{transform_indices = @transform_0, window_bounds = array<i64: 3, 128>}, {transform_indices = @transform_1, window_bounds = array<i64: 128, 27>}]} {
    %cst = arith.constant 0.000000e+00 : f32
    %0 = vector.broadcast %cst : f32 to vector<5x128xf32>
    %c0 = arith.constant 0 : index
    %c0_0 = arith.constant 0 : index
    %1 = vector.load %arg1[%c0, %c0_0] : memref<3x128xf32, #tpu.memory_space<vmem>>, vector<3x128xf32>
    %cst_1 = arith.constant 3.14159274 : f32
    %2 = vector.broadcast %cst_1 : f32 to vector<3x128xf32>
    %3 = arith.mulf %1, %2 : vector<3x128xf32>
    %cst_2 = arith.constant 1.57079637 : f32
    %4 = vector.broadcast %cst_2 : f32 to vector<3x128xf32>
    %5 = arith.addf %3, %4 : vector<3x128xf32>
    %6 = tpu.concatenate %3, %5 in 0 : vector<3x128xf32>, vector<3x128xf32> -> vector<6x128xf32>
    %7 = math.sin %6 : vector<6x128xf32>
    %8 = vector.extract_strided_slice %7 {offsets = [0, 0], sizes = [3, 128], strides = [1, 1]} : vector<6x128xf32> to vector<3x128xf32>
    %9 = vector.extract_strided_slice %7 {offsets = [3, 0], sizes = [3, 128], strides = [1, 1]} : vector<6x128xf32> to vector<3x128xf32>
    %cst_3 = arith.constant 2.000000e+00 : f32
    %10 = vector.broadcast %cst_3 : f32 to vector<3x128xf32>
    %11 = arith.mulf %10, %8 : vector<3x128xf32>
    %12 = arith.mulf %11, %9 : vector<3x128xf32>
    %cst_4 = arith.constant 2.000000e+00 : f32
    %13 = vector.broadcast %cst_4 : f32 to vector<3x128xf32>
    %14 = arith.mulf %13, %8 : vector<3x128xf32>
    %15 = arith.mulf %14, %8 : vector<3x128xf32>
    %cst_5 = arith.constant 1.000000e+00 : f32
    %16 = vector.broadcast %cst_5 : f32 to vector<3x128xf32>
    %17 = arith.subf %16, %15 : vector<3x128xf32>
    %18 = tpu.concatenate %12, %17 in 0 : vector<3x128xf32>, vector<3x128xf32> -> vector<6x128xf32>
    %cst_6 = arith.constant 2.000000e+00 : f32
    %19 = vector.broadcast %cst_6 : f32 to vector<3x128xf32>
    %20 = arith.mulf %19, %12 : vector<3x128xf32>
    %21 = arith.mulf %20, %17 : vector<3x128xf32>
    %cst_7 = arith.constant 2.000000e+00 : f32
    %22 = vector.broadcast %cst_7 : f32 to vector<3x128xf32>
    %23 = arith.mulf %22, %12 : vector<3x128xf32>
    %24 = arith.mulf %23, %12 : vector<3x128xf32>
    %cst_8 = arith.constant 1.000000e+00 : f32
    %25 = vector.broadcast %cst_8 : f32 to vector<3x128xf32>
    %26 = arith.subf %25, %24 : vector<3x128xf32>
    %27 = tpu.concatenate %21, %26 in 0 : vector<3x128xf32>, vector<3x128xf32> -> vector<6x128xf32>
    %cst_9 = arith.constant 2.000000e+00 : f32
    %28 = vector.broadcast %cst_9 : f32 to vector<3x128xf32>
    %29 = arith.mulf %28, %21 : vector<3x128xf32>
    %30 = arith.mulf %29, %26 : vector<3x128xf32>
    %cst_10 = arith.constant 2.000000e+00 : f32
    %31 = vector.broadcast %cst_10 : f32 to vector<3x128xf32>
    %32 = arith.mulf %31, %21 : vector<3x128xf32>
    %33 = arith.mulf %32, %21 : vector<3x128xf32>
    %cst_11 = arith.constant 1.000000e+00 : f32
    %34 = vector.broadcast %cst_11 : f32 to vector<3x128xf32>
    %35 = arith.subf %34, %33 : vector<3x128xf32>
    %36 = tpu.concatenate %30, %35 in 0 : vector<3x128xf32>, vector<3x128xf32> -> vector<6x128xf32>
    %37 = tpu.concatenate %1, %7, %18, %27, %36, %0 in 0 : vector<3x128xf32>, vector<6x128xf32>, vector<6x128xf32>, vector<6x128xf32>, vector<6x128xf32>, vector<5x128xf32> -> vector<32x128xf32>
    %38 = tpu.transpose %37, [1, 0] : vector<32x128xf32> -> vector<128x32xf32>
    %39 = vector.extract_strided_slice %38 {offsets = [0, 0], sizes = [128, 27], strides = [1, 1]} : vector<128x32xf32> to vector<128x27xf32>
    %c0_12 = arith.constant 0 : index
    %c0_13 = arith.constant 0 : index
    %40 = vector.load %arg2[%c0_12, %c0_13] : memref<128x27xf32, #tpu.memory_space<vmem>>, vector<128x27xf32>
    tpu.vector_store %arg2[%c0_12, %c0_13], %39 {strides = array<i32>} : memref<128x27xf32, #tpu.memory_space<vmem>>, vector<128x27xf32>,
    return
  }
  func.func @transform_0(%arg0: i32) -> (i32, i32) {
    %c0_i32 = arith.constant 0 : i32
    %c0_i32_0 = arith.constant 0 : i32
    return %c0_i32, %arg0 : i32, i32
  }
  func.func @transform_1(%arg0: i32) -> (i32, i32) {
    %c0_i32 = arith.constant 0 : i32
    %c0_i32_0 = arith.constant 0 : i32
    return %arg0, %c0_i32 : i32, i32
  }
}

</mosaic_0001>

<bundles_post_ra>
// kernel: tpu_custom_call.1
= control target key start
LH: loop header
LB: loop body
LE: loop exit
PB: predicated region body
PF: predicated region fallthrough
CT: control target
= control target key end

     0   :  { %6 = vsyncpa [#allocation3], 0  ;;  %s1252_s0 = inlined_call_operand.hbm [shape: f32[3,200], index: 0, kind: input, shape index: {}]   ;;  %s1253_s1 = inlined_call_operand.vmem [shape: f32[200,27], index: 1, kind: output, shape index: {}]  }
   0x1   :  { %8 = vsyncpa [#allocation3 + $0x1], 0  ;;  %s969_s6 = smov 0   ;;  %s971_s7 = smov 0  }
   0x2   :  { %s973_s8 = smov 0   ;;  %s975_s9 = smov 0  }
   0x3 LB: > { %s988_s10 = sadd.s32 4294967295, %s918_s9   ;;  %s991_s11 = sadd.s32 1, %s918_s9   ;;  %s918_s9 = sphi %s975_s9, %s1266_s9   ;;  %s914_s8 = sphi %s973_s8, %s1265_s8   ;;  %s910_s7 = sphi %s971_s7, %s1264_s7   ;;  %s906_s6 = sphi %s969_s6, %s1263_s6  }
   0x4   : > { %s18_s12 = ssub.s32 %s918_s9, %s991_s11  ;;  %s21_s13 = sadd.s32 1, %s914_s8 }
   0x5   : > { %p19_p0 = scmp.eq.s32.totalorder %s18_s12, 0  ;;  %p28_p1 = scmp.ne.s32.totalorder %s914_s8, %s910_s7 }
   0x6   : > { %p29_p2 = scmp.eq.s32.totalorder %s918_s9, 0  ;;  %p34_p3 = scmp.ne.s32.totalorder %s910_s7, %s906_s6 }
   0x7   : > { %s1001_s14 = scalar_select %p19_p0, %s914_s8, %s21_s13  }
   0x8   : > { %p1003_p4 = por %p29_p2, %p28_p1  ;;  %p35_p5 = scmp.eq.s32.totalorder %s988_s10, 0 }
   0x9   : > { %p58_p6 = scmp.eq.s32.totalorder %s988_s10, 1  ;;  %p717_p8 = scmp.lt.s32.totalorder %s918_s9, 2 }
   0xa   : > { %p1009_p7 = por %p35_p5, %p34_p3  ;;  %s84_s18 = sand.u32 1, %s914_s8  }
   0xb   : > { %p1014_p9 = por %p58_p6, %p28_p1  ;;  %s683_s19 = sshll.u32 %s84_s18, 2 }
   0xc   : > { %s684_s20 = sshll.u32 %s918_s9, 2  ;;  %s88_s24 = scalar_lea.vmem [#allocation2], %s683_s19 }
   0xd   : > { %s92_s23 = scalar_lea.hbm %s1252_s0, %s684_s20  ;;  %s96_s25 = sshll.u32 %s88_s24, 4  ;;  %s97_s25 = int_to_ptr.vmem [resolvable:$true] %s96_s25 }
   0xe   : > { %s94_s26 = sshll.u32 %s92_s23, 4  ;;  %p1025_p10 = pnand %p717_p8, %p1003_p4  ;;  %s95_s26 = int_to_ptr.hbm [resolvable:$true] %s94_s26 }
   0xf   : > { %p685_p11 = scmp.ge.s32.totalorder %s918_s9, 1  ;;  %p101_p12 = scmp.lt.s32.totalorder %s918_s9, 3 }
  0x10   : > { %s85_s28 = scalar_lea.sflag [#allocation3], %s84_s18  ;;  %s822_s29 = sshra.s32 %s95_s26, 4  ;;  %s823_s29 = int_to_ptr.hbm [resolvable:$true] %s822_s29 }
  0x11   : > { %s824_s30 = scalar_lea.hbm %s823_s29, 4  ;;  %p826_p0 = pneg %p1025_p10 }
  0x12   : > { %p825_p13 = scmp.ne.s32.totalorder %s823_s29, %s824_s30  ;;  %s829_s4 = scalar_lea.hbm %s1252_s0, 8 }
  0x13   : > { %p830_p3 = scmp.lt.s32.totalorder %s823_s29, %s1252_s0  ;;  %p831_p4 = scmp.lt.s32.totalorder %s829_s4, %s824_s30 }
  0x14   : > { %p827_p1 = pnand %p826_p0, %p825_p13 }
  0x15   : > { %p832_p5 = por %p831_p4, %p830_p3 }
  0x16   : > { %p828_p2 = pneg %p827_p1 }
  0x18   : > { %p833_p6 = pnand %p832_p5, %p828_p2 }
  0x1a   : > { %836 = shalt.err (!%p833_p6)
}
  0x1b   : > { %716 = dma.hbm_to_vmem [thread:$0]  (!%p1025_p10), %s95_s26, 64, %s97_s25, %s85_s28  }
  0x1c   : > { %p102_p8 = pnand %p685_p11, %p101_p12 }
  0x1d   : > { %s1046_s12 = sand.u32 (!%p102_p8), 1, %s910_s7  }
  0x1e   : > { %105 = sbr.rel (%p102_p8) target bundleno = 482 (0x1e2), region = 24  ;;  %s686_s13 = sshll.u32 (!%p102_p8), %s1046_s12, 2 }
  0x1f   : > { %s108_s15 = scalar_lea.sflag (!%p102_p8), [#allocation3], %s1046_s12  ;;  %s111_s18 = scalar_lea.vmem (!%p102_p8), [#allocation2], %s686_s13 }
  0x23   : > { %901 = dma.done.wait (%p1009_p7), %s108_s15, 64  }
  0x24   : > { %903 = vsyncadd (%p1009_p7), %s108_s15, 4294967232  ;;  %v1054_v0 = vld [vmem:[%s111_s18] sm:$0x7]  ;;  %vm141_vm0 = vcmask 1042432   ;;  %v952_v16 = vmov 683565275  }
  0x25   : > { %v136_v1 = vmul.f32 3.1415927, %v1054_v0  ;;  %v953_v18 = vmov 2475754826   ;;  %v954_v20 = vmov 2131351028  }
  0x26   : > { %v955_v22 = vmov 2102212464   ;;  %v956_v24 = vmov 920167782   ;;  %v957_v30 = vmov 1326507024  }
  0x27   : > { %v137_v2 = vadd.f32 1.5707964, %v136_v1  ;;  %s687_s9 = sshll.u32 %s1046_s12, 7  ;;  %s692_s19 = sshll.u32 (%p1014_p9), %s988_s10, 4 }
  0x28   : > { %s1111_s16 = scalar_lea.vmem [#allocation4], %s687_s9   ;;  %s708_s20 = sshll.u32 (%p1014_p9), %s988_s10, 7 }
  0x29   : > { %v139_v3 = vrot.slane %v137_v2, 5  ;;  %s401_s21 = ssub.s32 (%p1014_p9), 25, %s692_s19  ;;  %s1152_s24 = scalar_lea.vmem (%p1014_p9), %s1253_s1, %s708_s20  }
  0x2a   : > { %p402_p7 = scmp.lt.s32.totalorder (%p1014_p9), %s401_s21, 16 }
  0x2b   : > { %v1058_v4 = vsel %vm141_vm0, %v136_v1, %v139_v3 }
  0x2c   : > { %v146_v5 = vand.u32 2139095040, %v1058_v4  ;;  %v143_v7 = vand.u32 2147483647, %v1058_v4  ;;  %vm145_vm13 = vcmp.lt.s32.totalorder %v1058_v4, 0 }
  0x2e   : > { %v147_v6 = vshrl.u32 %v146_v5, 23  ;;  %v150_v10 = vand.u32 8388607, %v143_v7  ;;  %vm144_vm14 = vcmp.le.f32.partialorder %v143_v7, 0.7853982 }
  0x30   : > { %v688_v8 = vadd.s32 4294967169, %v147_v6  ;;  %v151_v13 = vor.u32 8388608, %v150_v10  ;;  %v958_v6 = vmov 0  }
  0x32   : > { %v153_v9 = vadd.s32 1, %v688_v8  ;;  %v1067_v32 = vshll.u32 %v151_v13, 8 }
  0x34   : > { %vm154_vm1 = vcmp.gt.s32.totalorder %v153_v9, 0  ;;  %v192_v44 = vand.u32 65535, %v1067_v32  ;;  %v193_v45 = vshrl.u32 %v1067_v32, 16 }
  0x35   : > { %v155_v11 = vsel %vm154_vm1, %v153_v9, 0 }
  0x36   : > { %v157_v12 = vand.u32 31, %v155_v11  ;;  %v1064_v14 = vshrl.u32 %v155_v11, 5 }
  0x38   : > { %v158_v15 = vsub.s32 32, %v157_v12  ;;  %v160_v17 = vshll.u32 %v952_v16, %v157_v12  ;;  %v163_v19 = vshll.u32 %v953_v18, %v157_v12  ;;  %v166_v21 = vshll.u32 %v954_v20, %v157_v12 }
  0x39   : > { %v169_v23 = vshll.u32 %v955_v22, %v157_v12  ;;  %v172_v25 = vshll.u32 %v956_v24, %v157_v12  ;;  %vm175_vm2 = vcmp.lt.s32.totalorder %v1064_v14, 1  ;;  %vm178_vm3 = vcmp.lt.s32.totalorder %v1064_v14, 4 }
  0x3a   : > { %v161_v26 = vshrl.u32 %v953_v18, %v158_v15  ;;  %v164_v27 = vshrl.u32 %v954_v20, %v158_v15  ;;  %v167_v28 = vshrl.u32 %v955_v22, %v158_v15  ;;  %v170_v29 = vshrl.u32 %v956_v24, %v158_v15 }
  0x3b   : > { %v173_v31 = vshrl.u32 %v957_v30, %v158_v15  ;;  %vm177_vm4 = vcmp.lt.s32.totalorder %v1064_v14, 3  ;;  %vm176_vm5 = vcmp.lt.s32.totalorder %v1064_v14, 2  ;;  %v159_v52 = vshrl.u32 %v952_v16, %v158_v15 }
  0x3c   : > { %v162_v33 = vor.u32 %v161_v26, %v160_v17  ;;  %v165_v34 = vor.u32 %v164_v27, %v163_v19  ;;  %v168_v35 = vor.u32 %v167_v28, %v166_v21  ;;  %v171_v36 = vor.u32 %v170_v29, %v169_v23 }
  0x3d   : > { %v174_v37 = vor.u32 %v173_v31, %v172_v25 }
  0x3e   : > { %v183_v38 = vsel %vm175_vm2, %v162_v33, %v165_v34  ;;  %v187_v39 = vsel %vm175_vm2, %v165_v34, %v168_v35  ;;  %v184_v40 = vsel %vm178_vm3, %v171_v36, 920167782  ;;  %v179_v2 = vsel %vm175_vm2, %v159_v52, %v162_v33 }
  0x3f   : > { %v188_v41 = vsel %vm178_vm3, %v174_v37, 1326507024  ;;  %v185_v42 = vsel %vm177_vm4, %v168_v35, %v184_v40  ;;  %v180_v5 = vsel %vm178_vm3, %v168_v35, 2102212464  ;;  %vm286_vm3 = vweird.f32 %v1058_v4 }
  0x40   : > { %v189_v43 = vsel %vm177_vm4, %v171_v36, %v188_v41  ;;  %v186_v46 = vsel %vm176_vm5, %v183_v38, %v185_v42  ;;  %v181_v17 = vsel %vm177_vm4, %v165_v34, %v180_v5  ;;  %vm337_vm4 = vcmask 1040384  }
  0x41   : > { %v190_v47 = vsel %vm176_vm5, %v187_v39, %v189_v43  ;;  %v216_v50 = vand.u32 65535, %v186_v46  ;;  %v217_v51 = vshrl.u32 %v186_v46, 16  ;;  %v182_v25 = vsel %vm176_vm5, %v179_v2, %v181_v17 }
  0x42   : > { %v194_v48 = vand.u32 65535, %v190_v47  ;;  %v195_v49 = vshrl.u32 %v190_v47, 16  ;;  %v236_v29 = vmul.u32 %v1067_v32, %v182_v25  ;;  %vm339_vm5 = vcmask 1046528  }
  0x43   : > { %v218_v56 = vmul.u32 %v216_v50, %v192_v44  ;;  %v219_v57 = vmul.u32 %v217_v51, %v192_v44  ;;  %v220_v58 = vmul.u32 %v216_v50, %v193_v45  ;;  %v221_v62 = vmul.u32 %v217_v51, %v193_v45 }
  0x44   : > { %v196_v53 = vmul.u32 %v194_v48, %v192_v44  ;;  %v197_v54 = vmul.u32 %v195_v49, %v192_v44  ;;  %v198_v55 = vmul.u32 %v194_v48, %v193_v45  ;;  %v199_v59 = vmul.u32 %v195_v49, %v193_v45 }
  0x45   : > { %v222_v63 = vshll.u32 %v219_v57, 16  ;;  %v224_v1 = vshll.u32 %v220_v58, 16  ;;  %v223_v15 = vshrl.u32 %v219_v57, 16  ;;  %v225_v21 = vshrl.u32 %v220_v58, 16 }
  0x46   : > { %v200_v60 = vshll.u32 %v197_v54, 16  ;;  %v202_v61 = vshll.u32 %v198_v55, 16  ;;  %v201_v10 = vshrl.u32 %v197_v54, 16  ;;  %v203_v18 = vshrl.u32 %v198_v55, 16 }
  0x47   : > { %vm226_vm7 = vc.u32 %v218_v56, %v222_v63  ;;  %v228_v9 = vadd.s32 %v222_v63, %v218_v56 }
  0x48   : > { %vm204_vm6 = vc.u32 %v196_v53, %v200_v60  ;;  %v206_v3 = vadd.s32 %v200_v60, %v196_v53  ;;  %v227_v12 = vsel %vm226_vm7, 1, %v958_v6  ;;  %vm376_vm7 = vcmask 220160  }
  0x49   : > { %v205_v8 = vsel %vm204_vm6, 1, %v958_v6  ;;  %v229_v16 = vadd.s32 %v227_v12, %v221_v62  ;;  %vm230_vm9 = vc.u32 %v228_v9, %v224_v1  ;;  %v232_v24 = vadd.s32 %v228_v9, %v224_v1 }
  0x4a   : > { %v207_v11 = vadd.s32 %v205_v8, %v199_v59  ;;  %vm208_vm8 = vc.u32 %v206_v3, %v202_v61  ;;  %v231_v20 = vsel %vm230_vm9, 1, %v958_v6  ;;  %vm341_vm6 = vcmask 1044480  }
  0x4b   : > { %v209_v13 = vsel %vm208_vm8, 1, %v958_v6  ;;  %v233_v22 = vadd.s32 %v231_v20, %v229_v16 }
  0x4c   : > { %v211_v19 = vadd.s32 %v209_v13, %v207_v11 }
  0x4d   : > { %v234_v26 = vadd.s32 %v233_v22, %v223_v15 }
  0x4e   : > { %v212_v23 = vadd.s32 %v211_v19, %v201_v10 }
  0x4f   : > { %v235_v28 = vadd.s32 %v234_v26, %v225_v21 }
  0x50   : > { %v213_v27 = vadd.s32 %v212_v23, %v203_v18 }
  0x51   : > { %v239_v30 = vadd.s32 1, %v235_v28 }
  0x52   : > { %vm238_vm10 = vc.u32 %v213_v27, %v232_v24  ;;  %v237_v14 = vadd.s32 %v232_v24, %v213_v27 }
  0x53   : > { %v240_v31 = vsel %vm238_vm10, %v239_v30, %v235_v28 }
  0x54   : > { %v241_v33 = vadd.s32 %v240_v31, %v236_v29 }
  0x56   : > { %v242_v34 = vadd.s32 536870912, %v241_v33 }
  0x58   : > { %v243_v35 = vshrl.u32 %v242_v34, 30 }
  0x5a   : > { %v244_v36 = vshll.u32 %v243_v35, 30  ;;  %v267_v53 = vsub.s32 4, %v243_v35 }
  0x5c   : > { %v245_v37 = vsub.s32 %v241_v33, %v244_v36  ;;  %v268_v56 = vsel %vm145_vm13, %v267_v53, %v243_v35 }
  0x5d   : > { %v270_v59 = vsel %vm144_vm14, 0, %v268_v56 }
  0x5e   : > { %vm246_vm11 = vcmp.lt.s32.totalorder %v245_v37, 0  ;;  %v247_v38 = vsub.s32 0, %v245_v37  ;;  %v287_v1 = vadd.s32 3, %v270_v59 }
  0x60   : > { %v248_v39 = vsel %vm246_vm11, %v247_v38, %v245_v37  ;;  %v288_v8 = vand.u32 3, %v287_v1 }
  0x61   : > { %v249_v40 = vclz %v248_v39 }
  0x62   : > { %vm293_vm15 = vcmp.eq.s32.totalorder %v288_v8, 2  ;;  %vm290_vm1 = vcmp.eq.s32.totalorder %v288_v8, 0  ;;  %vm289_vm2 = vcmp.lt.s32.totalorder %v288_v8, 2 }
  0x63   : > { %v689_v41 = vadd.s32 4294967294, %v249_v40 }
  0x65   : > { %vm690_vm12 = vcmp.lt.s32.totalorder %v689_v41, 0 }
  0x66   : > { %v252_v42 = vsel %vm690_vm12, 0, %v689_v41 }
  0x67   : > { %v253_v43 = vsub.s32 32, %v252_v42  ;;  %v254_v44 = vshll.u32 %v245_v37, %v252_v42  ;;  %v257_v45 = vsub.s32 4294967266, %v252_v42 }
  0x69   : > { %v255_v32 = vshrl.u32 %v237_v14, %v253_v43  ;;  %v258_v46 = vadd.s32 127, %v257_v45 }
  0x6b   : > { %v256_v47 = vor.u32 %v255_v32, %v254_v44  ;;  %v259_v48 = vshll.u32 %v258_v46, 23 }
  0x6d   : > { %v260_v49 = vor.u32 4788187, %v259_v48  ;;  %v263_v50 = vcvt.s32.f32 %v256_v47 }
  0x6f   : > { %v261_v51 = vand.u32 2147483647, %v260_v49 }
  0x71   : > { %v264_v52 = vmul.f32 %v263_v50, %v261_v51 }
  0x73   : > { %v265_v54 = vxor.u32 2147483648, %v264_v52 }
  0x75   : > { %v266_v55 = vsel %vm145_vm13, %v265_v54, %v264_v52 }
  0x76   : > { %v269_v57 = vsel %vm144_vm14, %v1058_v4, %v266_v55 }
  0x77   : > { %v271_v58 = vmul.f32 %v269_v57, %v269_v57 }
  0x79   : > { %v272_v60 = vmul.f32 -0.001358992, %v271_v58  ;;  %v279_v61 = vmul.f32 -0.00019511016, %v271_v58 }
  0x7b   : > { %v273_v62 = vadd.f32 0.041655596, %v272_v60  ;;  %v280_v63 = vadd.f32 0.008332121, %v279_v61 }
  0x7d   : > { %v274_v2 = vmul.f32 %v273_v62, %v271_v58  ;;  %v281_v3 = vmul.f32 %v280_v63, %v271_v58 }
  0x7f   : > { %v275_v5 = vadd.f32 -0.4999988, %v274_v2  ;;  %v282_v6 = vadd.f32 -0.16666654, %v281_v3 }
  0x81   : > { %v276_v9 = vmul.f32 %v275_v5, %v271_v58  ;;  %v283_v10 = vmul.f32 %v282_v6, %v271_v58 }
  0x83   : > { %v277_v7 = vadd.f32 1.0, %v276_v9  ;;  %v284_v11 = vadd.f32 1.0, %v283_v10 }
  0x85   : > { %v285_v12 = vmul.f32 %v284_v11, %v269_v57  ;;  %v294_v13 = vxor.u32 2147483648, %v277_v7 }
  0x87   : > { %v291_v15 = vxor.u32 2147483648, %v285_v12  ;;  %v295_v16 = vsel %vm293_vm15, %v294_v13, %v285_v12 }
  0x89   : > { %v292_v17 = vsel %vm290_vm1, %v277_v7, %v291_v15 }
  0x8a   : > { %v296_v18 = vsel %vm289_vm2, %v292_v17, %v295_v16 }
  0x8b   : > { %v297_v19 = vsel %vm286_vm3, nan, %v296_v18 }
  0x8c   : > { %v325_v20 = vrot.slane %v297_v19, 5  ;;  %v298_v21 = vmul.f32 2.0, %v297_v19  ;;  %v300_v22 = vrot.slane %v297_v19, 3 }
  0x8e   : > { %v336_v23 = vsel %vm141_vm0, %v1054_v0, %v325_v20  ;;  %v302_v24 = vmul.f32 %v300_v22, %v298_v21  ;;  %v303_v25 = vmul.f32 %v298_v21, %v297_v19 }
  0x8f   : > { %344 = vxpose.xlu0.b32.start [1/4] (short) %v336_v23, 128 }
  0x90   : > { %v304_v26 = vsub.f32 1.0, %v303_v25  ;;  %v309_v27 = vmul.f32 2.0, %v302_v24 }
  0x92   : > { %v306_v28 = vrot.slane %v304_v26, 5  ;;  %v310_v29 = vmul.f32 %v309_v27, %v304_v26  ;;  %v311_v30 = vmul.f32 %v309_v27, %v302_v24 }
  0x94   : > { %v308_v31 = vsel %vm141_vm0, %v302_v24, %v306_v28  ;;  %v312_v4 = vsub.f32 1.0, %v311_v30  ;;  %v317_v33 = vmul.f32 2.0, %v310_v29 }
  0x95   : > { %v328_v34 = vrot.slane %v308_v31, 7 }
  0x96   : > { %v314_v35 = vrot.slane %v312_v4, 5  ;;  %v319_v36 = vmul.f32 %v317_v33, %v310_v29  ;;  %v318_v38 = vmul.f32 %v317_v33, %v312_v4 }
  0x97   : > { %v338_v37 = vsel %vm337_vm4, %v325_v20, %v328_v34 }
  0x98   : > { %v316_v0 = vsel %vm141_vm0, %v310_v29, %v314_v35  ;;  %v320_v39 = vsub.f32 1.0, %v319_v36 }
  0x99   : > { %v331_v40 = vrot.slane %v316_v0, 1 }
  0x9a   : > { %v322_v41 = vrot.slane %v320_v39, 5 }
  0x9b   : > { %v340_v14 = vsel %vm339_vm5, %v338_v37, %v331_v40 }
  0x9c   : > { %345 = vxpose.xlu0.b32.cont [2/4] (short) %v340_v14, 128  ;;  %v324_v42 = vsel %vm141_vm0, %v318_v38, %v322_v41 }
  0x9d   : > { %v334_v43 = vrot.slane %v324_v42, 3 }
  0x9f   : > { %v342_v44 = vsel %vm341_vm6, %v331_v40, %v334_v43  ;;  %v343_v45 = vsel %vm141_vm0, %v334_v43, 0.0 }
  0xa4   : > { %346 = vxpose.xlu0.b32.cont [3/4] (short) %v342_v44, 128 }
  0xac   : > { %347 = vxpose.xlu0.b32.end [4/4] (short) %v343_v45, 128 }
 0x138   : > { %v360_v32 = vpop.trf.xlu0 }
 0x139   : > { %377 = vst.msk [vmem:[%s1111_s16] sm:$0xff] %vm376_vm7, %v360_v32 }
 0x140   : > { %v361_v46 = vpop.trf.xlu0 }
 0x141   : > { %378 = vst.msk [vmem:[%s1111_s16 + $0x8] sm:$0xff] %vm376_vm7, %v361_v46 }
 0x148   : > { %v362_v47 = vpop.trf.xlu0 }
 0x149   : > { %379 = vst.msk [vmem:[%s1111_s16 + $0x10] sm:$0xff] %vm376_vm7, %v362_v47 }
 0x150   : > { %v363_v48 = vpop.trf.xlu0 }
 0x151   : > { %380 = vst.msk [vmem:[%s1111_s16 + $0x18] sm:$0xff] %vm376_vm7, %v363_v48 }
 0x158   : > { %v364_v49 = vpop.trf.xlu0 }
 0x159   : > { %381 = vst.msk [vmem:[%s1111_s16 + $0x20] sm:$0xff] %vm376_vm7, %v364_v49 }
 0x160   : > { %v365_v50 = vpop.trf.xlu0 }
 0x161   : > { %382 = vst.msk [vmem:[%s1111_s16 + $0x28] sm:$0xff] %vm376_vm7, %v365_v50 }
 0x168   : > { %v366_v51 = vpop.trf.xlu0 }
 0x169   : > { %383 = vst.msk [vmem:[%s1111_s16 + $0x30] sm:$0xff] %vm376_vm7, %v366_v51 }
 0x170   : > { %v367_v52 = vpop.trf.xlu0 }
 0x171   : > { %384 = vst.msk [vmem:[%s1111_s16 + $0x38] sm:$0xff] %vm376_vm7, %v367_v52 }
 0x178   : > { %v368_v53 = vpop.trf.xlu0 }
 0x179   : > { %385 = vst.msk [vmem:[%s1111_s16 + $0x40] sm:$0xff] %vm376_vm7, %v368_v53 }
 0x180   : > { %v369_v54 = vpop.trf.xlu0 }
 0x181   : > { %386 = vst.msk [vmem:[%s1111_s16 + $0x48] sm:$0xff] %vm376_vm7, %v369_v54 }
 0x188   : > { %v370_v55 = vpop.trf.xlu0 }
 0x189   : > { %387 = vst.msk [vmem:[%s1111_s16 + $0x50] sm:$0xff] %vm376_vm7, %v370_v55 }
 0x190   : > { %v371_v56 = vpop.trf.xlu0 }
 0x191   : > { %388 = vst.msk [vmem:[%s1111_s16 + $0x58] sm:$0xff] %vm376_vm7, %v371_v56 }
 0x198   : > { %v372_v57 = vpop.trf.xlu0 }
 0x199   : > { %389 = vst.msk [vmem:[%s1111_s16 + $0x60] sm:$0xff] %vm376_vm7, %v372_v57 }
 0x1a0   : > { %v373_v58 = vpop.trf.xlu0 }
 0x1a1   : > { %390 = vst.msk [vmem:[%s1111_s16 + $0x68] sm:$0xff] %vm376_vm7, %v373_v58 }
 0x1a8   : > { %v374_v59 = vpop.trf.xlu0 }
 0x1a9   : > { %391 = vst.msk [vmem:[%s1111_s16 + $0x70] sm:$0xff] %vm376_vm7, %v374_v59 }
 0x1ad   : > { %399 = sbr.rel (!%p1014_p9) target bundleno = 482 (0x1e2), region = 32 }
 0x1b0   : > { %v375_v60 = vpop.trf.xlu0 }
 0x1b1   : > { %392 = vst.msk [vmem:[%s1111_s16 + $0x78] sm:$0xff] %vm376_vm7, %v375_v60 }
 0x1b2   : > { %s1268_s21 = smov (!%p402_p7, %s401_s21), 16 }
 0x1b3   : > { %s693_s25 = sshll.u32 %s1268_s21, 3 }
 0x1b4   : > { %p696_p10 = scmp.eq.s32.totalorder %s693_s25, 0 }
 0x1b5   : > { %s1158_s17 = sshrl.u32 (!%p696_p10), %s1268_s21, 4 }
 0x1b6   : > { %410 = sbr.rel (%p696_p10) target bundleno = 482 (0x1e2), region = 36  ;;  %p697_p9 = scmp.le.s32.totalorder (!%p696_p10), %s1158_s17, 0 }
 0x1bb   : > { %633 = sbr.rel (%p697_p9) target bundleno = 465 (0x1d1), region = 118  ;;  %s1258_s10 = smov (!%p697_p9), %s1152_s24 }
 0x1bc   : > { %s1259_s26 = smov (!%p697_p9), %s1111_s16  ;;  %s1167_s27 = smov (!%p697_p9), 0  }
 0x1bd   : > { %s1169_s28 = smov (!%p697_p9), 0  }
 0x1c0 LB: >> { %v503_v61 = vld [vmem:[%s926_s26] sm:$0xff]  ;;  %v505_v62 = vld [vmem:[%s926_s26 + $0x8] sm:$0xff]  ;;  %v507_v63 = vld [vmem:[%s926_s26 + $0x10] sm:$0xff]  ;;  %s535_s29 = sadd.s32 1, %s930_s27  ;;  %s497_s28 = sadd.s32 1, %s934_s28   ;;  %s934_s28 = sphi %s1169_s28, %s497_s28   ;;  %s930_s27 = sphi %s1167_s27, %s1262_s27   ;;  %s926_s26 = sphi %s1259_s26, %s1261_s26   ;;  %s922_s10 = sphi %s1258_s10, %s1260_s10  }
 0x1c1   : >> { %504 = vst [vmem:[%s922_s10] sm:$0xff] %v503_v61  ;;  %v509_v1 = vld [vmem:[%s926_s26 + $0x18] sm:$0xff]  ;;  %p536_p11 = scmp.ge.s32.totalorder %s535_s29, %s1158_s17  ;;  %v511_v2 = vld [vmem:[%s926_s26 + $0x20] sm:$0xff]  ;;  %v513_v3 = vld [vmem:[%s926_s26 + $0x28] sm:$0xff]  ;;  %p496_p12 = scmp.ge.s32.totalorder %s497_s28, %s1158_s17 }
 0x1c2   : >> { %506 = vst [vmem:[%s922_s10 + $0x8] sm:$0xff] %v505_v62  ;;  %v515_v5 = vld [vmem:[%s926_s26 + $0x30] sm:$0xff]  ;;  %v517_v6 = vld [vmem:[%s926_s26 + $0x38] sm:$0xff]  ;;  %v519_v8 = vld [vmem:[%s926_s26 + $0x40] sm:$0xff] }
 0x1c3   : >> { %508 = vst [vmem:[%s922_s10 + $0x10] sm:$0xff] %v507_v63  ;;  %s1270_s29 = smov (%p536_p11, %s535_s29), 0  ;;  %v521_v9 = vld [vmem:[%s926_s26 + $0x48] sm:$0xff]  ;;  %v523_v10 = vld [vmem:[%s926_s26 + $0x50] sm:$0xff]  ;;  %v525_v7 = vld [vmem:[%s926_s26 + $0x58] sm:$0xff] }
 0x1c4   : >> { %510 = vst [vmem:[%s922_s10 + $0x18] sm:$0xff] %v509_v1  ;;  %s698_s30 = sshll.u32 %s1270_s29, 7  ;;  %v527_v11 = vld [vmem:[%s926_s26 + $0x60] sm:$0xff]  ;;  %v529_v12 = vld [vmem:[%s926_s26 + $0x68] sm:$0xff]  ;;  %v531_v13 = vld [vmem:[%s926_s26 + $0x70] sm:$0xff]  ;;  %s1262_s27 = smov %s1270_s29 }
 0x1c5   : >> { %512 = vst [vmem:[%s922_s10 + $0x20] sm:$0xff] %v511_v2  ;;  %s540_s2 = scalar_lea.vmem %s1111_s16, %s698_s30 [#allocation4]   ;;  %s541_s3 = scalar_lea.vmem %s1152_s24, %s698_s30   ;;  %v533_v15 = vld [vmem:[%s926_s26 + $0x78] sm:$0xff] }
 0x1c6   : >> { %514 = vst [vmem:[%s922_s10 + $0x28] sm:$0xff] %v513_v3  ;;  %s1261_s26 = smov %s540_s2 }
 0x1c7   : >> { %516 = vst [vmem:[%s922_s10 + $0x30] sm:$0xff] %v515_v5 }
 0x1c8   : >> { %518 = vst [vmem:[%s922_s10 + $0x38] sm:$0xff] %v517_v6 }
 0x1c9   : >> { %520 = vst [vmem:[%s922_s10 + $0x40] sm:$0xff] %v519_v8 }
 0x1ca   : >> { %522 = vst [vmem:[%s922_s10 + $0x48] sm:$0xff] %v521_v9 }
 0x1cb   : >> { %524 = vst [vmem:[%s922_s10 + $0x50] sm:$0xff] %v523_v10 }
 0x1cc   : >> { %526 = vst [vmem:[%s922_s10 + $0x58] sm:$0xff] %v525_v7  ;;  %499 = sbr.rel (!%p496_p12) target bundleno = 448 (0x1c0), region = 124 }
 0x1cd   : >> { %528 = vst [vmem:[%s922_s10 + $0x60] sm:$0xff] %v527_v11 }
 0x1ce   : >> { %530 = vst [vmem:[%s922_s10 + $0x68] sm:$0xff] %v529_v12 }
 0x1cf   : >> { %532 = vst [vmem:[%s922_s10 + $0x70] sm:$0xff] %v531_v13 }
 0x1d0   : >> { %534 = vst [vmem:[%s922_s10 + $0x78] sm:$0xff] %v533_v15  ;;  %s1260_s10 = smov %s541_s3 }
 0x1d1 PF: > { %s1231_s4 = sand.u32 15, %s1268_s21   ;;  %s709_s5 = sshll.u32 %s1158_s17, 7 }
 0x1d2   : > { %s546_s6 = scalar_lea.vmem %s1111_s16, %s709_s5 [#allocation4]   ;;  %s548_s12 = scalar_lea.vmem %s1152_s24, %s709_s5  }
 0x1d3   : > { %p703_p13 = scmp.le.s32.totalorder %s1231_s4, 0 }
 0x1d4   : > { %s936_s13 = smov (!%p703_p13), %s548_s12   ;;  %s940_s15 = smov (!%p703_p13), %s546_s6  }
 0x1d5   : > { %647 = sbr.rel (%p703_p13) target bundleno = 482 (0x1e2), region = 129  ;;  %s944_s18 = smov (!%p703_p13), 0  }
 0x1d6   : > { %s948_s9 = smov (!%p703_p13), 0  }
 0x1da LB: >> { %v558_v16 = vld [vmem:[%s942_s15] sm:$0xff]  ;;  %s560_s19 = sadd.s32 1, %s946_s18  ;;  %s552_s9 = sadd.s32 1, %s950_s9   ;;  %s950_s9 = sphi %s948_s9, %s552_s9   ;;  %s946_s18 = sphi %s944_s18, %s945_s18   ;;  %s942_s15 = sphi %s940_s15, %s565_s15   ;;  %s938_s13 = sphi %s936_s13, %s566_s13  }
 0x1db   : >> { %559 = vst [vmem:[%s938_s13] sm:$0xff] %v558_v16  ;;  %p561_p0 = scmp.ge.s32.totalorder %s560_s19, %s1231_s4  ;;  %p551_p1 = scmp.ge.s32.totalorder %s552_s9, %s1231_s4 }
 0x1dd   : >> { %s1272_s19 = smov (%p561_p0, %s560_s19), 0  ;;  %554 = sbr.rel (!%p551_p1) target bundleno = 474 (0x1da), region = 135 }
 0x1de   : >> { %s704_s16 = sshll.u32 %s1272_s19, 3  ;;  %s945_s18 = smov %s1272_s19  }
 0x1df   : >> { %s565_s15 = scalar_lea.vmem %s546_s6, %s704_s16 [#allocation4]   ;;  %s566_s13 = scalar_lea.vmem %s548_s12, %s704_s16  }
 0x1e2 PF: > { %p11_p2 = scmp.ge.s32.totalorder %s991_s11, 4   ;;  %s1263_s6 = smov %s910_s7 }
 0x1e3   : > { %s1264_s7 = smov %s914_s8  ;;  %s1265_s8 = smov %s1001_s14 }
 0x1e4   : > { %s1266_s9 = smov %s991_s11  ;;  %13 = sbr.rel (!%p11_p2) target bundleno = 3 (0x3), region = 146 }
 0x1e9   :  { %582 = vsyncpa [#allocation3], 1 }
 0x1ea   :  { %584 = vsyncpa [#allocation3 + $0x1], 1 }

</bundles_post_ra>
